<compile_context>
chip_gen: v5e
topology: v5e:2x2
jax: 0.10.0
libtpu: 0.0.40
codegen_flags: <defaults>
</compile_context>

<pallas_src>
import functools

import jax
import jax.numpy as jnp
from jax import lax
from jax.experimental import pallas as pl
from jax.experimental.pallas import tpu as pltpu


def _num_tensorcores():
    """Best-effort TensorCore count of the local device (2 on megacore parts)."""
    try:
        kind = jax.devices()[0].device_kind.lower().replace(" ", "")
    except Exception:
        return 1
    if "lite" in kind or "v5e" in kind or "v6e" in kind:
        return 1                      # single-TensorCore generations
    if "v4" in kind or "v5p" in kind or "7" in kind:
        return 2                      # megacore / v7x: 2 TensorCores per device
    return 1


def _ibot_kernel(student_ref, teacher_ref, mask_ref, inv_msum_ref, center_ref,
                 loss_ref, tsum_ref, *,
                 inv_student_temp, inv_teacher_temp, inv_n, mxu_center):
    """One grid step: TB rows x NT patches x D classes.

    student_ref/teacher_ref: (TB, NT, D) native dtype (cast to f32 here)
    mask_ref:     (TB, NT, 1) native dtype
    inv_msum_ref: (TB, 1, 1) f32 = 1 / clamp(sum_N mask, 1)
    center_ref:   (1, 1, D)  f32
    Outputs (per-core accumulators, resident across the reduction grid axes):
      loss_ref: (1, 1, 1) sum over rows of masked-mean cross-entropy
      tsum_ref: (1, 1, D) sum over rows of mean_N(teacher_softmax)
    """
    @pl.when((pl.program_id(1) == 0) & (pl.program_id(2) == 0))
    def _():
        loss_ref[...] = jnp.zeros_like(loss_ref)
        tsum_ref[...] = jnp.zeros_like(tsum_ref)

    # --- student: log-softmax pieces (log_p never materialized) -------------
    s = student_ref[...].astype(jnp.float32) * inv_student_temp        # (TB,NT,D)
    s_max = jnp.max(s, axis=-1, keepdims=True)                         # (TB,NT,1)
    s_shift = s - s_max
    lse = jnp.log(jnp.sum(jnp.exp(s_shift), axis=-1, keepdims=True))   # (TB,NT,1)

    # --- teacher: softmax((t - center)/temp) kept UNnormalized --------------
    c_scaled = center_ref[...].astype(jnp.float32) * inv_teacher_temp  # (1,1,D)
    tl = teacher_ref[...].astype(jnp.float32) * inv_teacher_temp - c_scaled
    t_max = jnp.max(tl, axis=-1, keepdims=True)                        # (TB,NT,1)
    t_exp = jnp.exp(tl - t_max)                                        # (TB,NT,D)
    denom = jnp.sum(t_exp, axis=-1, keepdims=True)                     # (TB,NT,1)
    # NOTE: pl.reciprocal(..., approx=True) (EUP slot) is a free micro-opt once
    # its tolerance is validated on hardware; exact keeps numerics tight at a
    # per-row (1/D of the work) cost.
    rdenom = pl.reciprocal(denom, approx=False)                        # (TB,NT,1)

    # sum_D softmax == 1 (exact up to rounding), so
    #   ent = sum_D(-t * (s_shift - lse)) == lse - rdenom * sum_D(t_exp*s_shift)
    # and the normalized teacher softmax never exists as a (TB,NT,D) temp.
    ent = lse - rdenom * jnp.sum(t_exp * s_shift, axis=-1, keepdims=True)

    # masked mean over patches: w = mask / clamp(sum_N mask, 1)
    w = mask_ref[...].astype(jnp.float32) * inv_msum_ref[...]          # (TB,NT,1)
    ew = ent * w
    loss_ref[...] += jnp.sum(jnp.sum(ew, axis=1, keepdims=True),
                             axis=0, keepdims=True)                    # (1,1,1)

    # center statistic: sum over rows of mean_N(teacher_softmax)
    tb, nt, d = t_exp.shape
    if mxu_center:
        # Offload the rows*patches reduction to the otherwise idle MXU:
        # coeff^T @ t_exp, with coeff[b,n] = rdenom[b,n] / N folded into the LHS
        # (the layout-trivial flatten requires NT % 8 == 0, guaranteed here).
        coeff = (rdenom * inv_n).reshape(tb * nt, 1)                   # (K,1)
        part = lax.dot_general(coeff, t_exp.reshape(tb * nt, d),
                               dimension_numbers=(((0,), (0,)), ((), ())),
                               preferred_element_type=jnp.float32)     # (1,D)
        tsum_ref[...] += part.reshape(1, 1, d)
    else:
        tw = t_exp * (rdenom * inv_n)                                  # (TB,NT,D)
        tsum_ref[...] += jnp.sum(jnp.sum(tw, axis=1, keepdims=True),
                                 axis=0, keepdims=True)


def ibot_loss_pallas(student, teacher, masks, center, teacher_temp,
                     student_temp=0.1, center_momentum=0.9):
    """Pallas implementation of iBOTLoss.forward.

    student/teacher: (n_crops, batch, n_patches, proj_dim), any float dtype
                     (feed bf16 upstream on HBM-bound v5e/v6e for ~2x).
    masks:           (n_crops, batch, n_patches, 1), any numeric dtype.
    center:          (1, 1, proj_dim) buffer.
    Returns (loss, new_center); new_center mirrors update_center().
    """
    nc, bs, N, D = student.shape
    B = nc * bs

    # Inputs stream in native dtype; all math is f32 inside the kernel.
    # (If proj_dim is not a multiple of 128, lane utilization drops; real iBOT
    #  heads (D >= 512) are lane-dense, small demo heads just run slower.)
    s = student.reshape(B, N, D)
    t = teacher.reshape(B, N, D)
    m = masks.reshape(B, N, 1)

    # Tiny per-row 1/clamp(sum_N mask, 1); the raw mask itself streams to the
    # kernel, so no (B, N, 1) f32 weight tensor is materialized in HBM.
    msum = jnp.sum(m.reshape(B, N).astype(jnp.float32), axis=-1)
    inv_msum = (1.0 / jnp.maximum(msum, 1.0)).reshape(B, 1, 1)

    c = center.reshape(1, 1, D).astype(jnp.float32)

    # Core split only when it divides B: the big tensors are never padded.
    ncores = _num_tensorcores()
    if B % ncores != 0:
        ncores = 1
    per_core = B // ncores

    in_itemsize = jnp.dtype(s.dtype).itemsize
    m_itemsize = jnp.dtype(m.dtype).itemsize

    def working_set_bytes(tb_, nt_):
        # 2 big inputs x 2 pipeline buffers (native dtype) + ~4 tile-sized f32
        # intermediates + small per-row data + center/accumulators.
        big = tb_ * nt_ * D * (2 * 2 * in_itemsize + 4 * 4)
        small = tb_ * nt_ * (2 * m_itemsize + 3 * 4)
        return big + small + 16 * D * 4

    BUDGET = 24 << 20  # headroom under the explicit vmem limit below

    # Largest divisor of per_core whose working set fits (tb=1 always divides).
    tb = 1
    for dvr in range(1, per_core + 1):
        if per_core % dvr == 0 and working_set_bytes(dvr, N) <= BUDGET:
            tb = dvr
    nt = N
    if working_set_bytes(tb, N) > BUDGET:
        # Even tb=1 is too big (large heads on v7x's 64 MiB VMEM): tile the
        # patch axis. nt must be a multiple of 8 (sublane tiling) dividing N.
        cands = [dvr for dvr in range(8, N, 8)
                 if N % dvr == 0 and working_set_bytes(1, dvr) <= BUDGET]
        if cands:
            nt = max(cands)

    steps = per_core // tb
    nsteps = N // nt

    ws = working_set_bytes(tb, nt)
    vmem_limit = int(min(56 << 20, max(32 << 20, ws + (8 << 20))))

    kernel = functools.partial(
        _ibot_kernel,
        inv_student_temp=1.0 / float(student_temp),
        inv_teacher_temp=1.0 / float(teacher_temp),
        inv_n=1.0 / float(N),
        mxu_center=(nt % 8 == 0),
    )

    bytes_accessed = (s.size * in_itemsize + t.size * in_itemsize
                      + m.size * m_itemsize + inv_msum.size * 4 + c.size * 4
                      + ncores * (1 + D) * 4)
    cost = pl.CostEstimate(flops=14 * B * N * D,
                           transcendentals=2 * B * N * D,
                           bytes_accessed=int(bytes_accessed))

    row_map = lambda ci, bi, ni: (ci * steps + bi, ni, 0)

    loss_parts, tsum_parts = pl.pallas_call(
        kernel,
        out_shape=(
            jax.ShapeDtypeStruct((ncores, 1, 1), jnp.float32),
            jax.ShapeDtypeStruct((ncores, 1, D), jnp.float32),
        ),
        grid_spec=pltpu.PrefetchScalarGridSpec(
            num_scalar_prefetch=0,
            grid=(ncores, steps, nsteps),
            in_specs=[
                pl.BlockSpec((tb, nt, D), row_map),
                pl.BlockSpec((tb, nt, D), row_map),
                pl.BlockSpec((tb, nt, 1), row_map),
                pl.BlockSpec((tb, 1, 1), lambda ci, bi, ni: (ci * steps + bi, 0, 0)),
                pl.BlockSpec((1, 1, D), lambda ci, bi, ni: (0, 0, 0)),
            ],
            out_specs=[
                pl.BlockSpec((1, 1, 1), lambda ci, bi, ni: (ci, 0, 0)),
                pl.BlockSpec((1, 1, D), lambda ci, bi, ni: (ci, 0, 0)),
            ],
        ),
        compiler_params=pltpu.CompilerParams(
            dimension_semantics=("parallel", "arbitrary", "arbitrary"),
            vmem_limit_bytes=vmem_limit),
        cost_estimate=cost,
    )(s, t, m, inv_msum, c)

    # entropy(...).mean() == sum of per-row masked means / B
    loss = jnp.sum(loss_parts) / B
    # update_center: sum_B(mean_N(teacher_softmax)) / B, then EMA
    patches_center = (jnp.sum(tsum_parts, axis=0) / B).reshape(1, 1, D)
    new_center = (center * center_momentum
                  + patches_center * (1.0 - center_momentum))
    # TODO(synk): teacher_temp schedule (LinearAnneal) and the in-place center
    # buffer update live outside the kernel; caller threads new_center forward.
    return loss, new_center


def ibot_loss_ref(student, teacher, masks, center, teacher_temp,
                  student_temp=0.1, center_momentum=0.9):
    """Pure-JAX reference mirroring the PyTorch module."""
    nc, bs, N, D = student.shape
    s = student.reshape(-1, N, D).astype(jnp.float32) / student_temp
    t = jax.nn.softmax(
        (teacher.reshape(-1, N, D).astype(jnp.float32) - center) / teacher_temp,
        axis=-1)
    m = masks.reshape(-1, N, 1)[..., 0].astype(jnp.float32)
    ent = jnp.sum(-t * jax.nn.log_softmax(s, axis=-1), axis=-1)
    ent = jnp.sum(ent * m, axis=-1) / jnp.maximum(jnp.sum(m, axis=-1), 1.0)
    loss = ent.mean()
    pc = jnp.sum(t.mean(1), axis=0, keepdims=True) / t.shape[0]
    new_center = center * center_momentum + pc * (1.0 - center_momentum)
    return loss, new_center


if __name__ == "__main__":
    key = jax.random.PRNGKey(0)
    k1, k2, k3 = jax.random.split(key, 3)

    n_crops, batch, n_patches, proj_dim = 2, 2, 8, 32
    student = jax.random.normal(
        k1, (n_crops, batch, n_patches, proj_dim), jnp.float32)
    teacher = jax.random.normal(
        k2, (n_crops, batch, n_patches, proj_dim), jnp.float32)
    masks = (jax.random.uniform(k3, (n_crops, batch, n_patches, 1))
             > 0.5).astype(jnp.float32)
    # register_buffer('center', zeros(1, 1, projection_dim))
    center = jnp.zeros((1, 1, proj_dim), jnp.float32)
    teacher_temp = 0.04  # stand-in for teacher_temp_sch.get()

    loss, new_center = ibot_loss_pallas(
        student, teacher, masks, center, teacher_temp)
    jax.block_until_ready((loss, new_center))

    loss_r, center_r = ibot_loss_ref(
        student, teacher, masks, center, teacher_temp)
    assert jnp.allclose(loss, loss_r, atol=1e-4, rtol=1e-4), (loss, loss_r)
    # The MXU path may evaluate the center statistic with default (bf16-input)
    # dot precision; 1e-4 absolute on an EMA centering statistic is ample.
    assert jnp.allclose(new_center, center_r, atol=1e-4, rtol=1e-3), (
        new_center, center_r)

    print("KERNEL_OK")
</pallas_src>

<mosaic_0001>
module attributes {stable_mosaic.version = 11 : i64} {
  func.func @_ibot_kernel(%arg0: i32, %arg1: i32, %arg2: i32, %arg3: memref<4x8x32xf32, #tpu.memory_space<vmem>>, %arg4: memref<4x8x32xf32, #tpu.memory_space<vmem>>, %arg5: memref<4x8x1xf32, #tpu.memory_space<vmem>>, %arg6: memref<4x1x1xf32, #tpu.memory_space<vmem>>, %arg7: memref<1x1x32xf32, #tpu.memory_space<vmem>>, %arg8: memref<1x1x1xf32, #tpu.memory_space<vmem>>, %arg9: memref<1x1x32xf32, #tpu.memory_space<vmem>>) attributes {dimension_semantics = [#tpu.dimension_semantics<parallel>, #tpu.dimension_semantics<arbitrary>, #tpu.dimension_semantics<arbitrary>], iteration_bounds = array<i64: 1, 1, 1>, scalar_prefetch = 0 : i64, scratch_operands = 0 : i64, tpu.core_type = #tpu.core_type<tc>, window_params = [{transform_indices = @transform_0, window_bounds = array<i64: 4, 8, 32>}, {transform_indices = @transform_1, window_bounds = array<i64: 4, 8, 32>}, {transform_indices = @transform_2, window_bounds = array<i64: 4, 8, 1>}, {transform_indices = @transform_3, window_bounds = array<i64: 4, 1, 1>}, {pipeline_mode = #tpu.pipeline_mode<synchronous>, transform_indices = @transform_4, window_bounds = array<i64: 1, 1, 32>}, {transform_indices = @transform_5, window_bounds = array<i64: 1, 1, 1>}, {transform_indices = @transform_6, window_bounds = array<i64: 1, 1, 32>}]} {
    %c0_i32 = arith.constant 0 : i32
    %0 = arith.cmpi eq, %arg1, %c0_i32 : i32
    %c0_i32_0 = arith.constant 0 : i32
    %1 = arith.cmpi eq, %arg2, %c0_i32_0 : i32
    %2 = arith.andi %0, %1 : i1
    %3 = arith.extui %2 : i1 to i32
    %c0_i32_1 = arith.constant 0 : i32
    %4 = arith.cmpi ne, %3, %c0_i32_1 : i32
    scf.if %4 {
      %cst_39 = arith.constant 0.000000e+00 : f32
      %58 = vector.broadcast %cst_39 : f32 to vector<1x1x1xf32>
      %c0_40 = arith.constant 0 : index
      %c0_41 = arith.constant 0 : index
      %c0_42 = arith.constant 0 : index
      %59 = vector.load %arg8[%c0_40, %c0_41, %c0_42] : memref<1x1x1xf32, #tpu.memory_space<vmem>>, vector<1x1x1xf32>
      tpu.vector_store %arg8[%c0_40, %c0_41, %c0_42], %58 {strides = array<i32>} : memref<1x1x1xf32, #tpu.memory_space<vmem>>, vector<1x1x1xf32>,
      %cst_43 = arith.constant 0.000000e+00 : f32
      %60 = vector.broadcast %cst_43 : f32 to vector<1x1x32xf32>
      %c0_44 = arith.constant 0 : index
      %c0_45 = arith.constant 0 : index
      %c0_46 = arith.constant 0 : index
      %61 = vector.load %arg9[%c0_44, %c0_45, %c0_46] : memref<1x1x32xf32, #tpu.memory_space<vmem>>, vector<1x1x32xf32>
      tpu.vector_store %arg9[%c0_44, %c0_45, %c0_46], %60 {strides = array<i32>} : memref<1x1x32xf32, #tpu.memory_space<vmem>>, vector<1x1x32xf32>,
    } else {
    }
    %c0 = arith.constant 0 : index
    %c0_2 = arith.constant 0 : index
    %c0_3 = arith.constant 0 : index
    %5 = vector.load %arg3[%c0, %c0_2, %c0_3] : memref<4x8x32xf32, #tpu.memory_space<vmem>>, vector<4x8x32xf32>
    %cst = arith.constant 1.000000e+01 : f32
    %6 = vector.broadcast %cst : f32 to vector<4x8x32xf32>
    %7 = arith.mulf %5, %6 : vector<4x8x32xf32>
    %cst_4 = arith.constant dense<0xFF800000> : vector<4x8xf32>
    %8 = vector.multi_reduction <maximumf>, %7, %cst_4 [2] : vector<4x8x32xf32> to vector<4x8xf32>
    %9 = vector.shape_cast %8 : vector<4x8xf32> to vector<4x8x1xf32>
    %10 = vector.broadcast %9 : vector<4x8x1xf32> to vector<4x8x32xf32>
    %11 = arith.subf %7, %10 : vector<4x8x32xf32>
    %12 = math.exp %11 : vector<4x8x32xf32>
    %cst_5 = arith.constant dense<0.000000e+00> : vector<4x8xf32>
    %13 = vector.multi_reduction <add>, %12, %cst_5 [2] : vector<4x8x32xf32> to vector<4x8xf32>
    %14 = vector.shape_cast %13 : vector<4x8xf32> to vector<4x8x1xf32>
    %15 = math.log %14 : vector<4x8x1xf32>
    %c0_6 = arith.constant 0 : index
    %c0_7 = arith.constant 0 : index
    %c0_8 = arith.constant 0 : index
    %16 = vector.load %arg7[%c0_6, %c0_7, %c0_8] : memref<1x1x32xf32, #tpu.memory_space<vmem>>, vector<1x1x32xf32>
    %cst_9 = arith.constant 2.500000e+01 : f32
    %17 = vector.broadcast %cst_9 : f32 to vector<1x1x32xf32>
    %18 = arith.mulf %16, %17 : vector<1x1x32xf32>
    %c0_10 = arith.constant 0 : index
    %c0_11 = arith.constant 0 : index
    %c0_12 = arith.constant 0 : index
    %19 = vector.load %arg4[%c0_10, %c0_11, %c0_12] : memref<4x8x32xf32, #tpu.memory_space<vmem>>, vector<4x8x32xf32>
    %cst_13 = arith.constant 2.500000e+01 : f32
    %20 = vector.broadcast %cst_13 : f32 to vector<4x8x32xf32>
    %21 = arith.mulf %19, %20 : vector<4x8x32xf32>
    %22 = vector.broadcast %18 : vector<1x1x32xf32> to vector<4x8x32xf32>
    %23 = arith.subf %21, %22 : vector<4x8x32xf32>
    %cst_14 = arith.constant dense<0xFF800000> : vector<4x8xf32>
    %24 = vector.multi_reduction <maximumf>, %23, %cst_14 [2] : vector<4x8x32xf32> to vector<4x8xf32>
    %25 = vector.shape_cast %24 : vector<4x8xf32> to vector<4x8x1xf32>
    %26 = vector.broadcast %25 : vector<4x8x1xf32> to vector<4x8x32xf32>
    %27 = arith.subf %23, %26 : vector<4x8x32xf32>
    %28 = math.exp %27 : vector<4x8x32xf32>
    %cst_15 = arith.constant dense<0.000000e+00> : vector<4x8xf32>
    %29 = vector.multi_reduction <add>, %28, %cst_15 [2] : vector<4x8x32xf32> to vector<4x8xf32>
    %30 = vector.shape_cast %29 : vector<4x8xf32> to vector<4x8x1xf32>
    %31 = tpu.reciprocal %30 : vector<4x8x1xf32> -> vector<4x8x1xf32>
    %32 = arith.mulf %28, %11 : vector<4x8x32xf32>
    %cst_16 = arith.constant dense<0.000000e+00> : vector<4x8xf32>
    %33 = vector.multi_reduction <add>, %32, %cst_16 [2] : vector<4x8x32xf32> to vector<4x8xf32>
    %34 = vector.shape_cast %33 : vector<4x8xf32> to vector<4x8x1xf32>
    %35 = arith.mulf %31, %34 : vector<4x8x1xf32>
    %36 = arith.subf %15, %35 : vector<4x8x1xf32>
    %c0_17 = arith.constant 0 : index
    %c0_18 = arith.constant 0 : index
    %c0_19 = arith.constant 0 : index
    %37 = vector.load %arg5[%c0_17, %c0_18, %c0_19] : memref<4x8x1xf32, #tpu.memory_space<vmem>>, vector<4x8x1xf32>
    %c0_20 = arith.constant 0 : index
    %c0_21 = arith.constant 0 : index
    %c0_22 = arith.constant 0 : index
    %38 = vector.load %arg6[%c0_20, %c0_21, %c0_22] : memref<4x1x1xf32, #tpu.memory_space<vmem>>, vector<4x1x1xf32>
    %39 = vector.broadcast %38 : vector<4x1x1xf32> to vector<4x8x1xf32>
    %40 = arith.mulf %37, %39 : vector<4x8x1xf32>
    %41 = arith.mulf %36, %40 : vector<4x8x1xf32>
    %c0_23 = arith.constant 0 : index
    %c0_24 = arith.constant 0 : index
    %c0_25 = arith.constant 0 : index
    %42 = vector.load %arg8[%c0_23, %c0_24, %c0_25] : memref<1x1x1xf32, #tpu.memory_space<vmem>>, vector<1x1x1xf32>
    %cst_26 = arith.constant dense<0.000000e+00> : vector<4x1xf32>
    %43 = vector.multi_reduction <add>, %41, %cst_26 [1] : vector<4x8x1xf32> to vector<4x1xf32>
    %44 = vector.shape_cast %43 : vector<4x1xf32> to vector<4x1x1xf32>
    %cst_27 = arith.constant dense<0.000000e+00> : vector<1x1xf32>
    %45 = vector.multi_reduction <add>, %44, %cst_27 [0] : vector<4x1x1xf32> to vector<1x1xf32>
    %46 = vector.shape_cast %45 : vector<1x1xf32> to vector<1x1x1xf32>
    %47 = arith.addf %42, %46 : vector<1x1x1xf32>
    %c0_28 = arith.constant 0 : index
    %c0_29 = arith.constant 0 : index
    %c0_30 = arith.constant 0 : index
    %48 = vector.load %arg8[%c0_28, %c0_29, %c0_30] : memref<1x1x1xf32, #tpu.memory_space<vmem>>, vector<1x1x1xf32>
    tpu.vector_store %arg8[%c0_28, %c0_29, %c0_30], %47 {strides = array<i32>} : memref<1x1x1xf32, #tpu.memory_space<vmem>>, vector<1x1x1xf32>,
    %cst_31 = arith.constant 1.250000e-01 : f32
    %49 = vector.broadcast %cst_31 : f32 to vector<4x8x1xf32>
    %50 = arith.mulf %31, %49 : vector<4x8x1xf32>
    %51 = vector.shape_cast %50 : vector<4x8x1xf32> to vector<32x1xf32>
    %52 = vector.shape_cast %28 : vector<4x8x32xf32> to vector<32x32xf32>
    %cst_32 = arith.constant dense<0.000000e+00> : vector<1x32xf32>
    %53 = tpu.matmul %51, %52, %cst_32 {dimension_numbers = #tpu.dot_dimension_numbers<[0], [0], [1], [1], [0, 1, 1, 1], [], []>} : vector<32x1xf32>, vector<32x32xf32>, vector<1x32xf32> -> vector<1x32xf32>
    %c0_33 = arith.constant 0 : index
    %c0_34 = arith.constant 0 : index
    %c0_35 = arith.constant 0 : index
    %54 = vector.load %arg9[%c0_33, %c0_34, %c0_35] : memref<1x1x32xf32, #tpu.memory_space<vmem>>, vector<1x1x32xf32>
    %55 = vector.shape_cast %53 : vector<1x32xf32> to vector<1x1x32xf32>
    %56 = arith.addf %54, %55 : vector<1x1x32xf32>
    %c0_36 = arith.constant 0 : index
    %c0_37 = arith.constant 0 : index
    %c0_38 = arith.constant 0 : index
    %57 = vector.load %arg9[%c0_36, %c0_37, %c0_38] : memref<1x1x32xf32, #tpu.memory_space<vmem>>, vector<1x1x32xf32>
    tpu.vector_store %arg9[%c0_36, %c0_37, %c0_38], %56 {strides = array<i32>} : memref<1x1x32xf32, #tpu.memory_space<vmem>>, vector<1x1x32xf32>,
    return
  }
  func.func @transform_0(%arg0: i32, %arg1: i32, %arg2: i32) -> (i32, i32, i32) {
    %c1_i32 = arith.constant 1 : i32
    %0 = arith.muli %arg0, %c1_i32 : i32
    %1 = arith.addi %0, %arg1 : i32
    %c0_i32 = arith.constant 0 : i32
    %c0_i32_0 = arith.constant 0 : i32
    return %1, %arg2, %c0_i32 : i32, i32, i32
  }
  func.func @transform_1(%arg0: i32, %arg1: i32, %arg2: i32) -> (i32, i32, i32) {
    %c1_i32 = arith.constant 1 : i32
    %0 = arith.muli %arg0, %c1_i32 : i32
    %1 = arith.addi %0, %arg1 : i32
    %c0_i32 = arith.constant 0 : i32
    %c0_i32_0 = arith.constant 0 : i32
    return %1, %arg2, %c0_i32 : i32, i32, i32
  }
  func.func @transform_2(%arg0: i32, %arg1: i32, %arg2: i32) -> (i32, i32, i32) {
    %c1_i32 = arith.constant 1 : i32
    %0 = arith.muli %arg0, %c1_i32 : i32
    %1 = arith.addi %0, %arg1 : i32
    %c0_i32 = arith.constant 0 : i32
    %c0_i32_0 = arith.constant 0 : i32
    return %1, %arg2, %c0_i32 : i32, i32, i32
  }
  func.func @transform_3(%arg0: i32, %arg1: i32, %arg2: i32) -> (i32, i32, i32) {
    %c1_i32 = arith.constant 1 : i32
    %0 = arith.muli %arg0, %c1_i32 : i32
    %1 = arith.addi %0, %arg1 : i32
    %c0_i32 = arith.constant 0 : i32
    %c0_i32_0 = arith.constant 0 : i32
    %c0_i32_1 = arith.constant 0 : i32
    return %1, %c0_i32, %c0_i32_0 : i32, i32, i32
  }
  func.func @transform_4(%arg0: i32, %arg1: i32, %arg2: i32) -> (i32, i32, i32) {
    %c0_i32 = arith.constant 0 : i32
    %c0_i32_0 = arith.constant 0 : i32
    %c0_i32_1 = arith.constant 0 : i32
    %c0_i32_2 = arith.constant 0 : i32
    return %c0_i32, %c0_i32_0, %c0_i32_1 : i32, i32, i32
  }
  func.func @transform_5(%arg0: i32, %arg1: i32, %arg2: i32) -> (i32, i32, i32) {
    %c0_i32 = arith.constant 0 : i32
    %c0_i32_0 = arith.constant 0 : i32
    %c0_i32_1 = arith.constant 0 : i32
    return %arg0, %c0_i32, %c0_i32_0 : i32, i32, i32
  }
  func.func @transform_6(%arg0: i32, %arg1: i32, %arg2: i32) -> (i32, i32, i32) {
    %c0_i32 = arith.constant 0 : i32
    %c0_i32_0 = arith.constant 0 : i32
    %c0_i32_1 = arith.constant 0 : i32
    return %arg0, %c0_i32, %c0_i32_0 : i32, i32, i32
  }
}

</mosaic_0001>

<bundles_post_ra>
// kernel: tpu_custom_call.1
= control target key start
LH: loop header
LB: loop body
LE: loop exit
PB: predicated region body
PF: predicated region fallthrough
CT: control target
= control target key end

     0   :  { %12 = vsyncpa [#allocation3], 0  ;;  %s815_s0 = inlined_call_operand.vmem [shape: f32[4,8,32], index: 0, kind: input, shape index: {}]   ;;  %s816_s1 = inlined_call_operand.hbm [shape: f32[4,8,32], index: 1, kind: input, shape index: {}]   ;;  %s817_s2 = inlined_call_operand.vmem [shape: f32[4,8,1], index: 2, kind: input, shape index: {}]   ;;  %s818_s3 = inlined_call_operand.vmem [shape: f32[4,1,1], index: 3, kind: input, shape index: {}]   ;;  %s819_s4 = inlined_call_operand.vmem [shape: f32[1,1,32], index: 4, kind: input, shape index: {}]   ;;  %s820_s5 = inlined_call_operand.hbm [shape: f32[1,1,1], index: 5, kind: output, shape index: {0}]   ;;  %s821_s6 = inlined_call_operand.hbm [shape: f32[1,1,32], index: 6, kind: output, shape index: {1}]  }
   0x1   :  { %13 = vsyncpa [#allocation4], 0 }
   0x2   :  { %14 = vsyncpa [#allocation7], 0  ;;  %s33_s23 = sshll.u32 %s816_s1, 4  ;;  %s605_s24 = smov [#allocation2]   ;;  %s34_s23 = int_to_ptr.hbm [resolvable:$true] %s33_s23 }
   0x3   :  { %s35_s25 = sshll.u32 %s605_s24, 4  ;;  %s606_s26 = smov 128   ;;  %s36_s25 = int_to_ptr.vmem [resolvable:$true] %s35_s25 }
   0x4   :  { %s607_s27 = smov 8  }
   0x5   :  { %41 = dma.hbm_to_vmem [thread:$0]  %s34_s23, 512, %s36_s25, [#allocation3], %s606_s26, %s606_s26, %s607_s27  }
   0x6   :  { %599 = dma.done.wait [#allocation3], 512  }
   0x7   :  { %600 = vsyncadd [#allocation3], 4294966784  ;;  %v172_v0 = vld [vmem:[%s819_s4] sm:$0x1]  ;;  %v176_v1 = vld [vmem:[#allocation2 + $0x10] sm:$0xff]  ;;  %vm127_vm0 = vcmask 261120  }
   0x8   :  { %v174_v2 = vld [vmem:[#allocation2] sm:$0xff]  ;;  %v173_v3 = vmul.f32 25.0, %v172_v0  ;;  %v180_v4 = vmul.f32 25.0, %v176_v1  ;;  %v177_v6 = vld [vmem:[#allocation2 + $0x18] sm:$0xff]  ;;  %v175_v7 = vld [vmem:[#allocation2 + $0x8] sm:$0xff]  ;;  %s443_s29 = sshll.u32 %s820_s5, 4  ;;  %s444_s29 = int_to_ptr.hbm [resolvable:$true] %s443_s29 }
   0x9   :  { %v178_v5 = vmul.f32 25.0, %v174_v2  ;;  %v181_v11 = vmul.f32 25.0, %v177_v6  ;;  %v179_v12 = vmul.f32 25.0, %v175_v7  ;;  %v119_v32 = vld [vmem:[%s815_s0] sm:$0xff]  ;;  %v120_v39 = vld [vmem:[%s815_s0 + $0x8] sm:$0xff]  ;;  %v121_v40 = vld [vmem:[%s815_s0 + $0x10] sm:$0xff] }
   0xa   :  { %v183_v8 = vperm.slane %v173_v3, 0  ;;  %v123_v36 = vmul.f32 10.0, %v119_v32  ;;  %v124_v44 = vmul.f32 10.0, %v120_v39  ;;  %v125_v45 = vmul.f32 10.0, %v121_v40  ;;  %v122_v48 = vld [vmem:[%s815_s0 + $0x18] sm:$0xff]  ;;  %s610_s1 = smov [#allocation6]  }
   0xb   :  { %v691_v49 = vmul.f32 10.0, %v122_v48  ;;  %s452_s4 = sshll.u32 %s610_s1, 4  ;;  %s454_s8 = sshll.u32 %s821_s6, 4  ;;  %s453_s4 = int_to_ptr.vmem [resolvable:$true] %s452_s4  ;;  %s455_s8 = int_to_ptr.hbm [resolvable:$true] %s454_s8 }
   0xc   :  { %v187_v9 = vsub.f32 %v180_v4, %v183_v8  ;;  %v185_v10 = vsub.f32 %v178_v5, %v183_v8  ;;  %v188_v15 = vsub.f32 %v181_v11, %v183_v8  ;;  %v186_v16 = vsub.f32 %v179_v12, %v183_v8 }
   0xd   :  { %v128_v37 = vsel %vm127_vm0, %v123_v36, -inf  ;;  %v131_v46 = vsel %vm127_vm0, %v124_v44, -inf  ;;  %v134_v47 = vsel %vm127_vm0, %v125_v45, -inf  ;;  %v137_v50 = vsel %vm127_vm0, %v691_v49, -inf }
   0xe   :  { %v195_v13 = vsel %vm127_vm0, %v187_v9, -inf  ;;  %v189_v14 = vsel %vm127_vm0, %v185_v10, -inf  ;;  %v198_v17 = vsel %vm127_vm0, %v188_v15, -inf  ;;  %v192_v18 = vsel %vm127_vm0, %v186_v16, -inf }
   0xf   :  { %196 = vmax.xlane.f32.xlu1 %v195_v13  ;;  %190 = vmax.xlane.f32.xlu0 %v189_v14 }
  0x17   :  { %199 = vmax.xlane.f32.xlu1 %v198_v17  ;;  %193 = vmax.xlane.f32.xlu0 %v192_v18 }
  0x82   :  { %v197_v19 = vpop.xlane.xlu1 %196  ;;  %v191_v20 = vpop.xlane.xlu0 %190 }
  0x83   :  { %v203_v21 = vsub.f32 %v187_v9, %v197_v19  ;;  %v201_v22 = vsub.f32 %v185_v10, %v191_v20 }
  0x85   :  { %v209_v23 = vmul.f32 1.442695, %v203_v21  ;;  %v205_v24 = vmul.f32 1.442695, %v201_v22 }
  0x87   :  { %495 = vpow2.f32 %v209_v23 }
  0x88   :  { %497 = vpow2.f32 %v205_v24 }
  0x8a   :  { %v200_v25 = vpop.xlane.xlu1 %199  ;;  %v194_v26 = vpop.xlane.xlu0 %193 }
  0x8b   :  { %v204_v27 = vsub.f32 %v188_v15, %v200_v25  ;;  %v202_v28 = vsub.f32 %v186_v16, %v194_v26 }
  0x8d   :  { %v656_v29 = vpop.eup %495  ;;  %v211_v30 = vmul.f32 1.442695, %v204_v27  ;;  %v207_v31 = vmul.f32 1.442695, %v202_v28 }
  0x8e   :  { %v661_v33 = vpop.eup %497  ;;  %v219_v34 = vsel %vm127_vm0, %v656_v29, 0.0 }
  0x8f   :  { %499 = vpow2.f32 %v211_v30  ;;  %220 = vadd.xlane.f32.xlu0 %v219_v34  ;;  %v213_v35 = vsel %vm127_vm0, %v661_v33, 0.0 }
  0x90   :  { %501 = vpow2.f32 %v207_v31  ;;  %214 = vadd.xlane.f32.xlu2 %v213_v35 }
  0x95   :  { %v668_v38 = vpop.eup %499 }
  0x96   :  { %v676_v41 = vpop.eup %501  ;;  %424 = vmatpush.msra.mxu0 %v668_v38  ;;  %v222_v42 = vsel %vm127_vm0, %v668_v38, 0.0 }
  0x97   :  { %223 = vadd.xlane.f32.xlu1 %v222_v42  ;;  %v216_v43 = vsel %vm127_vm0, %v676_v41, 0.0  ;;  %129 = vmax.xlane.f32.xlu0 %v128_v37 }
  0x98   :  { %217 = vadd.xlane.f32.xlu2 %v216_v43  ;;  %425 = vmatpush.msra.mxu0 %v656_v29 }
  0x9a   :  { %426 = vmatpush.msra.mxu0 %v676_v41 }
  0x9c   :  { %427 = vmatpush.msra.mxu0 %v661_v33 }
  0x9f   :  { %132 = vmax.xlane.f32.xlu1 %v131_v46  ;;  %135 = vmax.xlane.f32.xlu0 %v134_v47 }
  0xa7   :  { %138 = vmax.xlane.f32.xlu1 %v137_v50 }
 0x102   :  { %v695_v51 = vpop.xlane.xlu0 %220 }
 0x103   :  { %v215_v52 = vpop.xlane.xlu2 %214  ;;  %vm258_vm6 = vweird.f32 %v695_v51  ;;  %v264_v26 = vand.u32 2147483648, %v695_v51  ;;  %v262_v30 = vand.u32 2147483647, %v695_v51 }
 0x104   :  { %503 = vrcp.f32 %v215_v52  ;;  %v234_v62 = vand.u32 2147483647, %v215_v52  ;;  %v236_v63 = vand.u32 2147483648, %v215_v52  ;;  %vm230_vm2 = vweird.f32 %v215_v52 }
 0x105   :  { %505 = vrcp.f32 %v695_v51  ;;  %vm263_vm12 = vcmp.eq.f32.partialorder %v262_v30, 8.507059e+37 }
 0x106   :  { %vm235_vm4 = vcmp.eq.f32.partialorder %v234_v62, 8.507059e+37  ;;  %v237_v7 = vor.u32 1.1754944e-38, %v236_v63 }
 0x10a   :  { %v504_v53 = vpop.eup %503  ;;  %v698_v54 = vpop.xlane.xlu1 %223 }
 0x10b   :  { %v130_v55 = vpop.xlane.xlu0 %129  ;;  %v700_v56 = vpop.eup %505  ;;  %v226_v57 = vmul.f32 %v504_v53, %v215_v52  ;;  %vm231_vm1 = vweird.f32 %v504_v53  ;;  %vm272_vm13 = vweird.f32 %v698_v54  ;;  %v276_v52 = vand.u32 2147483647, %v698_v54 }
 0x10c   :  { %v218_v58 = vpop.xlane.xlu2 %217  ;;  %v702_v60 = vsub.f32 %v123_v36, %v130_v55  ;;  %v254_v61 = vmul.f32 %v700_v56, %v695_v51  ;;  %vm232_vm3 = vmor %vm230_vm2, %vm231_vm1  ;;  %vm259_vm8 = vweird.f32 %v700_v56  ;;  %vm115_vm2 = vcmask 0  }
 0x10d   :  { %507 = vrcp.f32 %v218_v58  ;;  %v227_v59 = vsub.f32 1.0, %v226_v57  ;;  %v250_v19 = vand.u32 2147483648, %v218_v58  ;;  %v248_v20 = vand.u32 2147483647, %v218_v58  ;;  %vm733_vm11 = vmor %vm258_vm6, %vm259_vm8 }
 0x10e   :  { %509 = vrcp.f32 %v698_v54  ;;  %v144_v1 = vmul.f32 1.442695, %v702_v60  ;;  %v255_v4 = vsub.f32 1.0, %v254_v61  ;;  %vm244_vm7 = vweird.f32 %v218_v58 }
 0x10f   :  { %v228_v0 = vmul.f32 %v504_v53, %v227_v59  ;;  %v251_v27 = vor.u32 1.1754944e-38, %v250_v19  ;;  %vm249_vm10 = vcmp.eq.f32.partialorder %v248_v20, 8.507059e+37  ;;  %vm277_vm1 = vcmp.eq.f32.partialorder %v276_v52, 8.507059e+37 }
 0x110   :  { %511 = vpow2.f32 %v144_v1  ;;  %v256_v18 = vmul.f32 %v700_v56, %v255_v4 }
 0x111   :  { %v229_v2 = vadd.f32 %v504_v53, %v228_v0 }
 0x112   :  { %v133_v5 = vpop.xlane.xlu1 %132  ;;  %v257_v35 = vadd.f32 %v700_v56, %v256_v18 }
 0x113   :  { %v508_v3 = vpop.eup %507  ;;  %v136_v6 = vpop.xlane.xlu0 %135  ;;  %v708_v9 = vsub.f32 %v124_v44, %v133_v5  ;;  %v233_v11 = vsel %vm232_vm3, %v504_v53, %v229_v2  ;;  %v265_v44 = vor.u32 1.1754944e-38, %v264_v26  ;;  %v281_v53 = vmul.f32 %v661_v33, %v702_v60 }
 0x114   :  { %v240_v8 = vmul.f32 %v508_v3, %v218_v58  ;;  %v710_v10 = vsub.f32 %v125_v45, %v136_v6  ;;  %v712_v12 = vpop.eup %509  ;;  %v714_v13 = vsel %vm235_vm4, %v237_v7, %v233_v11  ;;  %vm245_vm5 = vweird.f32 %v508_v3  ;;  %v305_v7 = vld [vmem:[%s817_s2] sm:$0xff] }
 0x115   :  { %v146_v15 = vmul.f32 1.442695, %v708_v9  ;;  %v373_v17 = vmul.f32 0.125, %v714_v13  ;;  %v268_v22 = vmul.f32 %v712_v12, %v698_v54  ;;  %vm246_vm9 = vmor %vm244_vm7, %vm245_vm5  ;;  %v261_v48 = vsel %vm733_vm11, %v700_v56, %v257_v35 }
 0x116   :  { %v241_v14 = vsub.f32 1.0, %v240_v8  ;;  %v148_v16 = vmul.f32 1.442695, %v710_v10  ;;  %v512_v21 = vpop.eup %511  ;;  %vm273_vm14 = vweird.f32 %v712_v12  ;;  %v747_v50 = vsel %vm263_vm12, %v265_v44, %v261_v48 }
 0x117   :  { %513 = vpow2.f32 %v146_v15  ;;  %377 = vxpose.xlu2.b32.start [1/4] (short) (narrow) %v373_v17, 8  ;;  %v152_v24 = vsel %vm127_vm0, %v512_v21, 0.0  ;;  %v269_v31 = vsub.f32 1.0, %v268_v22  ;;  %vm274_vm15 = vmor %vm272_vm13, %vm273_vm14  ;;  %v375_v56 = vmul.f32 0.125, %v747_v50  ;;  %v492_v15 = vld [vmem:[%s818_s3 + $0x1] ss:$0 sm:$0xff] }
 0x118   :  { %v242_v23 = vmul.f32 %v508_v3, %v241_v14  ;;  %515 = vpow2.f32 %v148_v16  ;;  %153 = vadd.xlane.f32.xlu0 %v152_v24  ;;  %v285_v61 = vsel %vm127_vm0, %v281_v53, 0.0  ;;  %v282_v33 = vmul.f32 %v676_v41, %v708_v9  ;;  %v306_v17 = vld [vmem:[%s817_s2 + $0x8] sm:$0xff]  ;;  %v307_v21 = vld [vmem:[%s817_s2 + $0x10] sm:$0xff] }
 0x119   :  { %v270_v46 = vmul.f32 %v712_v12, %v269_v31  ;;  %v608_v9 = vmov 0.0   ;;  %vm117_vm3 = vcmask 253952   ;;  %vm334_vm4 = vcmask 7168  }
 0x11a   :  { %v243_v25 = vadd.f32 %v508_v3, %v242_v23  ;;  %v139_v28 = vpop.xlane.xlu1 %138  ;;  %v288_v63 = vsel %vm127_vm0, %v282_v33, 0.0  ;;  %116 = vst.msk [vmem:[#allocation5] sm:$0x1] %vm115_vm2, %v608_v9  ;;  %v326_v24 = vmul.f32 %v492_v15, %v306_v17 }
 0x11b   :  { %v143_v32 = vsub.f32 %v691_v49, %v139_v28  ;;  %v278_v49 = vand.u32 2147483648, %v698_v54  ;;  %v271_v51 = vadd.f32 %v712_v12, %v270_v46  ;;  %v283_v54 = vmul.f32 %v656_v29, %v710_v10  ;;  %v491_v29 = vld [vmem:[%s818_s3] ss:$0 sm:$0xff]  ;;  %118 = vst.msk [vmem:[#allocation6] sm:$0x1] %vm117_vm3, %v608_v9 }
 0x11c   :  { %v247_v34 = vsel %vm246_vm9, %v508_v3, %v243_v25  ;;  %v325_v10 = vmul.f32 %v491_v29, %v305_v7 }
 0x11d   :  { %v729_v36 = vsel %vm249_vm10, %v251_v27, %v247_v34  ;;  %v514_v39 = vpop.eup %513  ;;  %v150_v40 = vmul.f32 1.442695, %v143_v32  ;;  %v279_v57 = vor.u32 1.1754944e-38, %v278_v49  ;;  %v275_v59 = vsel %vm274_vm15, %v712_v12, %v271_v51 }
 0x11e   :  { %v374_v42 = vmul.f32 0.125, %v729_v36  ;;  %v516_v43 = vpop.eup %515  ;;  %v155_v45 = vsel %vm127_vm0, %v514_v39, 0.0  ;;  %v291_v0 = vsel %vm127_vm0, %v283_v54, 0.0  ;;  %v284_v1 = vmul.f32 %v668_v38, %v143_v32  ;;  %v494_v39 = vld [vmem:[%s818_s3 + $0x3] ss:$0 sm:$0xff] }
 0x11f   :  { %517 = vpow2.f32 %v150_v40  ;;  %156 = vadd.xlane.f32.xlu1 %v155_v45  ;;  %v158_v47 = vsel %vm127_vm0, %v516_v43, 0.0  ;;  %v757_v62 = vsel %vm277_vm1, %v279_v57, %v275_v59 }
 0x120   :  { %378 = vxpose.xlu2.b32.cont [2/4] (short) (narrow) %v374_v42, 8  ;;  %159 = vadd.xlane.f32.xlu0 %v158_v47  ;;  %v376_v60 = vmul.f32 0.125, %v757_v62  ;;  %v294_v2 = vsel %vm127_vm0, %v284_v1, 0.0  ;;  %v308_v42 = vld [vmem:[%s817_s2 + $0x18] sm:$0xff]  ;;  %s609_s2 = smov [#allocation5]  }
 0x121   :  { %v328_v48 = vmul.f32 %v494_v39, %v308_v42 }
 0x125   :  { %v518_v55 = vpop.eup %517 }
 0x126   :  { %v161_v58 = vsel %vm127_vm0, %v518_v55, 0.0 }
 0x127   :  { %162 = vadd.xlane.f32.xlu1 %v161_v58 }
 0x128   :  { %379 = vxpose.xlu2.b32.cont [3/4] (short) (narrow) %v375_v56, 8  ;;  %286 = vadd.xlane.f32.xlu0 %v285_v61 }
 0x12f   :  { %289 = vadd.xlane.f32.xlu1 %v288_v63 }
 0x130   :  { %380 = vxpose.xlu2.b32.end [4/4] (short) (narrow) %v376_v60, 8  ;;  %292 = vadd.xlane.f32.xlu0 %v291_v0 }
 0x137   :  { %295 = vadd.xlane.f32.xlu1 %v294_v2 }
 0x18b   :  { %v154_v3 = vpop.xlane.xlu0 %153 }
 0x18c   :  { %519 = vlog2.f32 %v154_v3 }
 0x192   :  { %v157_v41 = vpop.xlane.xlu1 %156  ;;  %v520_v5 = vpop.eup %519 }
 0x193   :  { %v160_v4 = vpop.xlane.xlu0 %159  ;;  %521 = vlog2.f32 %v157_v41  ;;  %v165_v38 = vmul.f32 0.6931472, %v520_v5 }
 0x194   :  { %523 = vlog2.f32 %v160_v4 }
 0x199   :  { %v522_v12 = vpop.eup %521 }
 0x19a   :  { %v163_v6 = vpop.xlane.xlu1 %162  ;;  %v524_v16 = vpop.eup %523  ;;  %v167_v18 = vmul.f32 0.6931472, %v522_v12  ;;  %v333_v12 = vld [vmem:[#allocation5] sm:$0x1] }
 0x19b   :  { %v287_v8 = vpop.xlane.xlu0 %286  ;;  %525 = vlog2.f32 %v163_v6  ;;  %v169_v22 = vmul.f32 0.6931472, %v524_v16  ;;  %v432_v16 = vld [vmem:[#allocation6] sm:$0x1] }
 0x19c   :  { %v297_v11 = vmul.f32 %v287_v8, %v714_v13  ;;  %v493_v13 = vld [vmem:[%s818_s3 + $0x2] ss:$0 sm:$0xff]  ;;  %s441_s3 = sshll.u32 %s609_s2, 4  ;;  %s442_s3 = int_to_ptr.vmem [resolvable:$true] %s441_s3 }
 0x19d   :  { %v327_v30 = vmul.f32 %v493_v13, %v307_v21 }
 0x19e   :  { %v301_v14 = vsub.f32 %v165_v38, %v297_v11 }
 0x1a0   :  { %v329_v19 = vmul.f32 %v325_v10, %v301_v14 }
 0x1a1   :  { %v526_v32 = vpop.eup %525 }
 0x1a2   :  { %v290_v20 = vpop.xlane.xlu1 %289  ;;  %v335_v23 = vsel %vm334_vm4, %v329_v19, 0.0 }
 0x1a3   :  { %v298_v25 = vmul.f32 %v290_v20, %v729_v36  ;;  %v336_v26 = vrot.slane %v335_v23, 4  ;;  %v293_v27 = vpop.xlane.xlu0 %292  ;;  %v171_v36 = vmul.f32 0.6931472, %v526_v32 }
 0x1a4   :  { %v299_v31 = vmul.f32 %v293_v27, %v747_v50 }
 0x1a5   :  { %v302_v28 = vsub.f32 %v167_v18, %v298_v25  ;;  %v337_v34 = vadd.f32 %v336_v26, %v335_v23 }
 0x1a6   :  { %v303_v37 = vsub.f32 %v169_v22, %v299_v31 }
 0x1a7   :  { %v330_v35 = vmul.f32 %v326_v24, %v302_v28  ;;  %v338_v40 = vrot.slane %v337_v34, 2 }
 0x1a8   :  { %v331_v44 = vmul.f32 %v327_v30, %v303_v37 }
 0x1a9   :  { %v342_v43 = vsel %vm334_vm4, %v330_v35, 0.0  ;;  %v339_v50 = vadd.f32 %v338_v40, %v337_v34 }
 0x1aa   :  { %v343_v45 = vrot.slane %v342_v43, 4  ;;  %v296_v46 = vpop.xlane.xlu1 %295  ;;  %v349_v47 = vsel %vm334_vm4, %v331_v44, 0.0 }
 0x1ab   :  { %v300_v49 = vmul.f32 %v296_v46, %v757_v62  ;;  %v350_v52 = vrot.slane %v349_v47, 4  ;;  %v340_v58 = vrot.slane %v339_v50, 1 }
 0x1ac   :  { %v344_v51 = vadd.f32 %v343_v45, %v342_v43 }
 0x1ad   :  { %v304_v53 = vsub.f32 %v171_v36, %v300_v49  ;;  %v351_v56 = vadd.f32 %v350_v52, %v349_v47  ;;  %v341_v1 = vadd.f32 %v340_v58, %v339_v50 }
 0x1ae   :  { %v345_v55 = vrot.slane %v344_v51, 2 }
 0x1af   :  { %v332_v57 = vmul.f32 %v328_v48, %v304_v53  ;;  %v352_v61 = vrot.slane %v351_v56, 2  ;;  %v363_v5 = vsel %vm334_vm4, %v341_v1, 0.0 }
 0x1b0   :  { %v346_v59 = vadd.f32 %v345_v55, %v344_v51 }
 0x1b1   :  { %v393_v33 = vpop.trf.xlu2  ;;  %v356_v54 = vsel %vm334_vm4, %v332_v57, 0.0  ;;  %v353_v63 = vadd.f32 %v352_v61, %v351_v56 }
 0x1b2   :  { %484 = vmatmul.msk.f32.vlgmr.msra.gmra.mxu0 %vm127_vm0, %v393_v33  ;;  %v347_v60 = vrot.slane %v346_v59, 1  ;;  %v357_v0 = vrot.slane %v356_v54, 4 }
 0x1b3   :  { %v354_v2 = vrot.slane %v353_v63, 1 }
 0x1b4   :  { %v348_v62 = vadd.f32 %v347_v60, %v346_v59  ;;  %v358_v3 = vadd.f32 %v357_v0, %v356_v54 }
 0x1b5   :  { %v355_v29 = vadd.f32 %v354_v2, %v353_v63 }
 0x1b6   :  { %v364_v41 = vsel %vm334_vm4, %v348_v62, 0.0  ;;  %v359_v4 = vrot.slane %v358_v3, 2 }
 0x1b7   :  { %v365_v7 = vadd.f32 %v364_v41, %v363_v5  ;;  %v366_v8 = vsel %vm334_vm4, %v355_v29, 0.0 }
 0x1b8   :  { %v360_v6 = vadd.f32 %v359_v4, %v358_v3 }
 0x1b9   :  { %v367_v10 = vadd.f32 %v366_v8, %v365_v7 }
 0x1ba   :  { %v361_v38 = vrot.slane %v360_v6, 1 }
 0x1bc   :  { %v362_v9 = vadd.f32 %v361_v38, %v360_v6 }
 0x1be   :  { %v368_v11 = vsel %vm334_vm4, %v362_v9, 0.0 }
 0x1bf   :  { %v369_v14 = vadd.f32 %v368_v11, %v367_v10 }
 0x1c1   :  { %v370_v15 = vadd.f32 %v369_v14, %v333_v12 }
 0x1c3   :  { %372 = vst.msk [vmem:[#allocation5] sm:$0x1] %vm115_vm2, %v370_v15 }
 0x1c4   :  { %446 = dma.vmem_to_hbm [thread:$0]  %s442_s3, 16, %s444_s29, [#allocation4]  }
 0x22f   :  { %v429_v17 = vpop.f32.mrf.mxu0 }
 0x230   :  { %v433_v18 = vadd.f32 %v432_v16, %v429_v17 }
 0x232   :  { %435 = vst.msk [vmem:[#allocation6] sm:$0x1] %vm117_vm3, %v433_v18 }
 0x233   :  { %457 = dma.vmem_to_hbm [thread:$0]  %s453_s4, 16, %s455_s8, [#allocation7]  }
 0x234   :  { %601 = dma.done.wait [#allocation4], 16  }
 0x235   :  { %602 = vsyncadd [#allocation4], 4294967280 }
 0x236   :  { %603 = dma.done.wait [#allocation7], 16  }
 0x237   :  { %604 = vsyncadd [#allocation7], 4294967280 }
 0x238   :  { %466 = vsyncpa [#allocation3], 1 }
 0x239   :  { %467 = vsyncpa [#allocation4], 1 }
 0x23a   :  { %468 = vsyncpa [#allocation7], 1 }

</bundles_post_ra>
